<compile_context>
chip_gen: v5e
topology: v5e:2x2
jax: 0.10.0
libtpu: 0.0.40
codegen_flags: <defaults>
</compile_context>

<pallas_src>
import functools

import jax
import jax.numpy as jnp
from jax.experimental import pallas as pl
from jax.experimental.pallas import tpu as pltpu

_LANE = 128
_VMEM_CEILING = 48 * 1024 * 1024      # safe on v7x (64 MiB physical VMEM)


def _round_up(x, m):
    return ((x + m - 1) // m) * m


def _sublane_pack(dtype):
    """Rows per packed sublane group: 8 (f32), 16 (bf16), 32 (int8/fp8)."""
    return max(8, 32 // jnp.dtype(dtype).itemsize)


def _choose_tile_n(n, c, dtype):
    """Size the batch tile by bytes, bounded by a VMEM budget and 8192 rows."""
    itemsize = jnp.dtype(dtype).itemsize
    pack = _sublane_pack(dtype)
    c_pad = _round_up(c, _LANE)
    # Padded VMEM bytes per row, double-buffered (logits tile + lane-padded
    # (tile_n, 1) targets tile).
    per_row_vmem = 2 * (c_pad * itemsize + _LANE * 4)
    rows_by_vmem = max(pack, (3 * _VMEM_CEILING // 4) // per_row_vmem)
    # ~4 MiB of streamed (unpadded) logits per tile amortizes the ~0.35 us
    # per-grid-step overhead even for small class counts.
    rows_by_stream = max(pack, (4 * 1024 * 1024) // max(1, c * itemsize))
    rows = min(rows_by_stream, rows_by_vmem, 8192)
    if n <= rows:
        return _round_up(n, pack)
    return max(pack, (rows // pack) * pack)


def _vmem_limit_bytes(tile_n, c, itemsize):
    """Buffer math for the actual tile (+25% slack), generation-safe ceiling."""
    c_pad = _round_up(c, _LANE)
    logits_buf = tile_n * c_pad * itemsize
    tgt_buf = tile_n * _LANE * 4
    out_buf = 8 * _LANE * 4
    need = 2 * (logits_buf + tgt_buf + out_buf)           # double-buffered
    need = int(need * 1.25) + (1 << 20)                   # slack + headroom
    return max(min(need, _VMEM_CEILING), 16 * 1024 * 1024)


def _focal_loss_kernel(logits_ref, targets_ref, out_ref, *,
                       alpha, gamma, n_rows, tile_n, num_blocks, exp_in_bf16):
    pid = pl.program_id(0)

    logits = logits_ref[...].astype(jnp.float32)          # (tile_n, C) f32 vregs
    tgt = targets_ref[...]                                  # (tile_n, 1) int32
    tn, c = logits.shape

    # Row max, then ONE shifted full-tile temp feeding both lane reductions.
    m = jnp.max(logits, axis=-1, keepdims=True)             # (tile_n, 1)
    shifted = logits - m                                     # (tile_n, C), <= 0
    class_ids = jax.lax.broadcasted_iota(jnp.int32, (tn, c), 1)
    one_hot = class_ids == tgt                               # (tile_n, C) bool

    if exp_in_bf16:
        # v6e/v7x: bf16 EUP roughly doubles exp throughput; ~1e-3 rel error.
        exp_shifted = jnp.exp(shifted.astype(jnp.bfloat16)).astype(jnp.float32)
    else:
        exp_shifted = jnp.exp(shifted)
    sum_exp = jnp.sum(exp_shifted, axis=-1, keepdims=True)
    tgt_shifted = jnp.sum(jnp.where(one_hot, shifted, 0.0), axis=-1,
                          keepdims=True)

    ce = jnp.log(sum_exp) - tgt_shifted                      # per-sample CE
    pt = jnp.exp(-ce)

    g = float(gamma)
    if g == 0.0:
        focal = alpha * ce                                   # (1 - pt)**0 == 1
    else:
        one_minus_pt = jnp.maximum(1.0 - pt, 0.0)            # clamp: no NaN
        if g.is_integer() and 1.0 <= g <= 8.0:
            mod = one_minus_pt                                # repeated mul (VPU)
            for _ in range(int(g) - 1):
                mod = mod * one_minus_pt
        else:
            mod = one_minus_pt ** g                           # generic pow
        focal = alpha * mod * ce

    def write_block_sum(vals):
        s = jnp.sum(vals)                                     # XLU reduce (free slot)
        out_ref[...] = jnp.broadcast_to(s, out_ref.shape).astype(out_ref.dtype)

    rem = n_rows % tile_n
    if rem == 0:
        write_block_sum(focal)                                # lean full-tile path
    else:
        last = num_blocks - 1

        @pl.when(pid != last)
        def _full():
            write_block_sum(focal)

        @pl.when(pid == last)
        def _partial():
            # Mask padded rows BEFORE the sum so they never contribute.
            row = jax.lax.broadcasted_iota(jnp.int32, focal.shape, 0)
            write_block_sum(jnp.where(row < rem, focal, 0.0))


def focal_loss(logits, targets, *, alpha=1.0, gamma=0.0, size_average=True,
               tile_n=None, exp_in_bf16=False):
    """logits: (N, C) float (f32 or bf16), targets: (N,) int — scalar f32."""
    n, c = logits.shape
    dtype = logits.dtype
    itemsize = jnp.dtype(dtype).itemsize
    pack = _sublane_pack(dtype)
    if tile_n is None:
        tile_n = _choose_tile_n(n, c, dtype)
    else:
        tile_n = max(pack, _round_up(int(tile_n), pack))     # dtype-aware pack
    num_blocks = pl.cdiv(n, tile_n)

    targets2d = targets.astype(jnp.int32).reshape(n, 1)

    kernel = functools.partial(
        _focal_loss_kernel,
        alpha=float(alpha),
        gamma=float(gamma),
        n_rows=n,
        tile_n=tile_n,
        num_blocks=num_blocks,
        exp_in_bf16=bool(exp_in_bf16),
    )

    cost = pl.CostEstimate(
        flops=8 * n * c,
        transcendentals=n * c + 2 * n,           # exp per class + exp/log per row
        bytes_accessed=n * c * itemsize + n * 4 + num_blocks * _LANE * 4,
    )

    partials = pl.pallas_call(
        kernel,
        out_shape=jax.ShapeDtypeStruct((num_blocks, 1, _LANE), jnp.float32),
        grid=(num_blocks,),
        in_specs=[
            pl.BlockSpec((tile_n, c), lambda i: (i, 0)),     # logits tile
            pl.BlockSpec((tile_n, 1), lambda i: (i, 0)),     # targets tile
        ],
        # Per-block partial sum, lane-dense and partitioned by the parallel
        # axis (megacore-friendly on v7x, unmasked vst).
        out_specs=pl.BlockSpec((1, 1, _LANE), lambda i: (i, 0, 0)),
        compiler_params=pltpu.CompilerParams(
            dimension_semantics=("parallel",),
            vmem_limit_bytes=_vmem_limit_bytes(tile_n, c, itemsize),
        ),
        cost_estimate=cost,
    )(logits, targets2d)

    total = jnp.sum(partials[:, 0, 0])                        # tiny XLA reduce
    if size_average:
        total = total / jnp.float32(n)
    return total


def _focal_loss_ref(logits, targets, *, alpha=1.0, gamma=0.0, size_average=True):
    logits = logits.astype(jnp.float32)
    lse = jax.nn.logsumexp(logits, axis=-1)
    tgt_logit = jnp.take_along_axis(logits, targets[:, None], axis=-1)[:, 0]
    ce = lse - tgt_logit
    pt = jnp.exp(-ce)
    mod = jnp.ones_like(ce) if gamma == 0 else jnp.maximum(1.0 - pt, 0.0) ** gamma
    fl = alpha * mod * ce
    return fl.mean() if size_average else fl.sum()


if __name__ == "__main__":
    key = jax.random.PRNGKey(0)
    k1, k2, k3, k4 = jax.random.split(key, 4)

    # Case 1: default FocalLoss(): alpha=1, gamma=0, size_average=True.
    N, C = 8, 32
    logits = jax.random.normal(k1, (N, C), dtype=jnp.float32)
    targets = jax.random.randint(k2, (N,), 0, C, dtype=jnp.int32)

    out = focal_loss(logits, targets, alpha=1.0, gamma=0.0, size_average=True)
    out = jax.block_until_ready(out)
    ref = _focal_loss_ref(logits, targets, alpha=1.0, gamma=0.0, size_average=True)
    assert jnp.allclose(out, ref, rtol=1e-5, atol=1e-5), (out, ref)

    # Case 2: non-trivial gamma + sum reduction (single block).
    out2 = focal_loss(logits, targets, alpha=0.25, gamma=2.0, size_average=False)
    out2 = jax.block_until_ready(out2)
    ref2 = _focal_loss_ref(logits, targets, alpha=0.25, gamma=2.0,
                           size_average=False)
    assert jnp.allclose(out2, ref2, rtol=1e-5, atol=1e-5), (out2, ref2)

    # Case 3: multi-block "parallel" grid with a partial last tile (masking),
    # f32, forced small tile so the grid actually loops (40 = 16 + 16 + 8).
    N3, C3 = 40, 32
    logits3 = jax.random.normal(k3, (N3, C3), dtype=jnp.float32)
    targets3 = jax.random.randint(k4, (N3,), 0, C3, dtype=jnp.int32)

    out3 = focal_loss(logits3, targets3, alpha=0.5, gamma=2.0,
                      size_average=True, tile_n=16)
    out3 = jax.block_until_ready(out3)
    ref3 = _focal_loss_ref(logits3, targets3, alpha=0.5, gamma=2.0,
                           size_average=True)
    assert jnp.allclose(out3, ref3, rtol=1e-5, atol=1e-5), (out3, ref3)

    # Case 4: bf16 logits stream (halved HBM traffic) + forced tile_n=8, which
    # the wrapper rounds up to the bf16 sublane pack (16); partial last tile.
    logits3_bf16 = logits3.astype(jnp.bfloat16)
    out4 = focal_loss(logits3_bf16, targets3, alpha=0.5, gamma=2.0,
                      size_average=True, tile_n=8)
    out4 = jax.block_until_ready(out4)
    ref4 = _focal_loss_ref(logits3_bf16.astype(jnp.float32), targets3,
                           alpha=0.5, gamma=2.0, size_average=True)
    assert jnp.allclose(out4, ref4, rtol=1e-4, atol=1e-4), (out4, ref4)

    # Case 5: optional bf16 exponent path (v6e/v7x EUP lever) — validated
    # against the f32 reference with loosened tolerance per its ~1e-3 numerics.
    out5 = focal_loss(logits3, targets3, alpha=1.0, gamma=2.0,
                      size_average=True, tile_n=16, exp_in_bf16=True)
    out5 = jax.block_until_ready(out5)
    ref5 = _focal_loss_ref(logits3, targets3, alpha=1.0, gamma=2.0,
                           size_average=True)
    assert jnp.allclose(out5, ref5, rtol=3e-2, atol=3e-2), (out5, ref5)

    print("KERNEL_OK")
</pallas_src>

<mosaic_0001>
module attributes {stable_mosaic.version = 11 : i64} {
  func.func @_focal_loss_kernel(%arg0: i32, %arg1: memref<8x32xf32, #tpu.memory_space<vmem>>, %arg2: memref<8x1xi32, #tpu.memory_space<vmem>>, %arg3: memref<1x1x128xf32, #tpu.memory_space<vmem>>) attributes {dimension_semantics = [#tpu.dimension_semantics<parallel>], iteration_bounds = array<i64: 1>, scalar_prefetch = 0 : i64, scratch_operands = 0 : i64, tpu.core_type = #tpu.core_type<tc>, window_params = [{transform_indices = @transform_0, window_bounds = array<i64: 8, 32>}, {transform_indices = @transform_1, window_bounds = array<i64: 8, 1>}, {transform_indices = @transform_2, window_bounds = array<i64: 1, 1, 128>}]} {
    %c0 = arith.constant 0 : index
    %c0_0 = arith.constant 0 : index
    %0 = vector.load %arg1[%c0, %c0_0] : memref<8x32xf32, #tpu.memory_space<vmem>>, vector<8x32xf32>
    %c0_1 = arith.constant 0 : index
    %c0_2 = arith.constant 0 : index
    %1 = vector.load %arg2[%c0_1, %c0_2] : memref<8x1xi32, #tpu.memory_space<vmem>>, vector<8x1xi32>
    %cst = arith.constant dense<0xFF800000> : vector<8xf32>
    %2 = vector.multi_reduction <maximumf>, %0, %cst [1] : vector<8x32xf32> to vector<8xf32>
    %3 = vector.shape_cast %2 : vector<8xf32> to vector<8x1xf32>
    %4 = vector.broadcast %3 : vector<8x1xf32> to vector<8x32xf32>
    %5 = arith.subf %0, %4 : vector<8x32xf32>
    %6 = tpu.iota {dimensions = array<i32: 1>} : vector<8x32xi32>
    %7 = vector.broadcast %1 : vector<8x1xi32> to vector<8x32xi32>
    %8 = arith.cmpi eq, %6, %7 : vector<8x32xi32>
    %9 = math.exp %5 : vector<8x32xf32>
    %cst_3 = arith.constant dense<0.000000e+00> : vector<8xf32>
    %10 = vector.multi_reduction <add>, %9, %cst_3 [1] : vector<8x32xf32> to vector<8xf32>
    %11 = vector.shape_cast %10 : vector<8xf32> to vector<8x1xf32>
    %cst_4 = arith.constant 0.000000e+00 : f32
    %12 = vector.broadcast %cst_4 : f32 to vector<8x32xf32>
    %13 = arith.select %8, %5, %12 : vector<8x32xi1>, vector<8x32xf32>
    %cst_5 = arith.constant dense<0.000000e+00> : vector<8xf32>
    %14 = vector.multi_reduction <add>, %13, %cst_5 [1] : vector<8x32xf32> to vector<8xf32>
    %15 = vector.shape_cast %14 : vector<8xf32> to vector<8x1xf32>
    %16 = math.log %11 : vector<8x1xf32>
    %17 = arith.subf %16, %15 : vector<8x1xf32>
    %cst_6 = arith.constant 1.000000e+00 : f32
    %18 = vector.broadcast %cst_6 : f32 to vector<8x1xf32>
    %19 = arith.mulf %18, %17 : vector<8x1xf32>
    %20 = vector.shape_cast %19 : vector<8x1xf32> to vector<1x8x1xf32>
    %cst_7 = arith.constant dense<0.000000e+00> : vector<1xf32>
    %21 = vector.multi_reduction <add>, %20, %cst_7 [1, 2] : vector<1x8x1xf32> to vector<1xf32>
    %22 = vector.shape_cast %21 : vector<1xf32> to vector<1x1x1xf32>
    %23 = vector.extract %22[0, 0, 0] : f32 from vector<1x1x1xf32>
    %24 = vector.broadcast %23 : f32 to vector<1x1x128xf32>
    %c0_8 = arith.constant 0 : index
    %c0_9 = arith.constant 0 : index
    %c0_10 = arith.constant 0 : index
    %25 = vector.load %arg3[%c0_8, %c0_9, %c0_10] : memref<1x1x128xf32, #tpu.memory_space<vmem>>, vector<1x1x128xf32>
    tpu.vector_store %arg3[%c0_8, %c0_9, %c0_10], %24 {strides = array<i32>} : memref<1x1x128xf32, #tpu.memory_space<vmem>>, vector<1x1x128xf32>,
    return
  }
  func.func @transform_0(%arg0: i32) -> (i32, i32) {
    %c0_i32 = arith.constant 0 : i32
    %c0_i32_0 = arith.constant 0 : i32
    return %arg0, %c0_i32 : i32, i32
  }
  func.func @transform_1(%arg0: i32) -> (i32, i32) {
    %c0_i32 = arith.constant 0 : i32
    %c0_i32_0 = arith.constant 0 : i32
    return %arg0, %c0_i32 : i32, i32
  }
  func.func @transform_2(%arg0: i32) -> (i32, i32, i32) {
    %c0_i32 = arith.constant 0 : i32
    %c0_i32_0 = arith.constant 0 : i32
    %c0_i32_1 = arith.constant 0 : i32
    return %arg0, %c0_i32, %c0_i32_0 : i32, i32, i32
  }
}

</mosaic_0001>

<bundles_post_ra>
// kernel: tpu_custom_call.1
= control target key start
LH: loop header
LB: loop body
LE: loop exit
PB: predicated region body
PF: predicated region fallthrough
CT: control target
= control target key end

     0   :  { %vm14_vm0 = vcmask 261120   ;;  %s130_s0 = inlined_call_operand.vmem [shape: f32[8,32], index: 0, kind: input, shape index: {}]   ;;  %s131_s1 = inlined_call_operand.vmem [shape: s32[8,1], index: 1, kind: input, shape index: {}]   ;;  %s132_s2 = inlined_call_operand.hbm [shape: f32[1,1,128], index: 2, kind: output, shape index: {}]  }
   0x1   :  { %v12_v0 = vld [vmem:[%s130_s0] sm:$0xff] }
   0x2   :  { %7 = vsyncpa [#allocation3], 0  ;;  %v15_v1 = vsel %vm14_vm0, %v12_v0, -inf  ;;  %v101_v2 = vmov 0   ;;  %v13_v3 = vld [vmem:[%s131_s1] sm:$0xff]  ;;  %v19_v9 = vlaneseq  ;;  %vm37_vm2 = vcmask 7168  }
   0x3   :  { %70 = vset.pattern.permute.xlu0 %v101_v2  ;;  %s102_s0 = smov [#allocation2]   ;;  %s57_s15 = sshll.u32 %s132_s2, 4  ;;  %s58_s15 = int_to_ptr.hbm [resolvable:$true] %s57_s15 }
   0x4   :  { %16 = vmax.xlane.f32.xlu0 %v15_v1  ;;  %v20_v10 = vand.u32 127, %v19_v9  ;;  %s55_s1 = sshll.u32 %s102_s0, 4  ;;  %s56_s1 = int_to_ptr.vmem [resolvable:$true] %s55_s1 }
  0x18   :  { %22 = vperm.xlu0 %70, %v13_v3  }
  0x77   :  { %v17_v4 = vpop.xlane.xlu0 %16 }
  0x78   :  { %v18_v5 = vsub.f32 %v12_v0, %v17_v4 }
  0x7a   :  { %v25_v6 = vmul.f32 1.442695, %v18_v5 }
  0x7c   :  { %71 = vpow2.f32 %v25_v6 }
  0x82   :  { %v72_v7 = vpop.eup %71 }
  0x83   :  { %v27_v8 = vsel %vm14_vm0, %v72_v7, 0.0 }
  0x84   :  { %28 = vadd.xlane.f32.xlu1 %v27_v8 }
  0x8a   :  { %v23_v11 = vpop.permute.xlu0 %22 }
  0x8b   :  { %vm24_vm1 = vcmp.eq.s32.totalorder %v20_v10, %v23_v11 }
  0x8c   :  { %v30_v12 = vsel %vm24_vm1, %v18_v5, 0.0 }
  0x8d   :  { %v31_v13 = vsel %vm14_vm0, %v30_v12, 0.0 }
  0x8e   :  { %32 = vadd.xlane.f32.xlu1 %v31_v13 }
  0xf7   :  { %v29_v14 = vpop.xlane.xlu1 %28 }
  0xf8   :  { %73 = vlog2.f32 %v29_v14 }
  0xfe   :  { %v74_v15 = vpop.eup %73 }
  0xff   :  { %v35_v16 = vmul.f32 0.6931472, %v74_v15 }
 0x101   :  { %v33_v17 = vpop.xlane.xlu1 %32 }
 0x102   :  { %v36_v18 = vsub.f32 %v35_v16, %v33_v17 }
 0x104   :  { %v38_v19 = vsel %vm37_vm2, %v36_v18, 0.0 }
 0x105   :  { %39 = vadd.xlane.f32.xlu2 %v38_v19 }
 0x178   :  { %v40_v20 = vpop.xlane.xlu2 %39 }
 0x179   :  { %v41_v21 = vrot.slane %v40_v20, 4 }
 0x17b   :  { %v42_v22 = vadd.f32 %v41_v21, %v40_v20 }
 0x17d   :  { %v43_v23 = vrot.slane %v42_v22, 2 }
 0x17f   :  { %v44_v24 = vadd.f32 %v43_v23, %v42_v22 }
 0x181   :  { %v45_v25 = vrot.slane %v44_v24, 1 }
 0x183   :  { %v46_v26 = vadd.f32 %v45_v25, %v44_v24 }
 0x185   :  { %66 = vpush %v46_v26 }
 0x1b6   :  { %s67_s16 = spop %66 }
 0x1b7   :  { %v48_v27 = vstv %s67_s16 }
 0x1b8   :  { %49 = vst [vmem:[#allocation2] sm:$0x1] %v48_v27 }
 0x1b9   :  { %60 = dma.vmem_to_hbm [thread:$0]  %s56_s1, 16, %s58_s15, [#allocation3]  }
 0x1ba   :  { %99 = dma.done.wait [#allocation3], 16  }
 0x1bb   :  { %100 = vsyncadd [#allocation3], 4294967280 }
 0x1bc   :  { %65 = vsyncpa [#allocation3], 1 }

</bundles_post_ra>
